<compile_context>
chip_gen: v7x
topology: tpu7x:2x2x1
jax: 0.10.0
libtpu: 0.0.40
codegen_flags: <defaults>
</compile_context>

<pallas_src>
import math

import jax
import jax.numpy as jnp
from jax import lax
from jax.experimental import pallas as pl
from jax.experimental.pallas import tpu as pltpu


def _attn_kernel(x1_ref, x2_ref, c_ref, out_ref):
    # Prepacked constant buffer layout (one VMEM operand, one DMA):
    #   rows 0:8 , cols 0:8  -> Wq^T * (1/sqrt(d))
    #   rows 8:16, cols 0:17 -> [Wk^T | Wv^T | 0]   (zero column pairs with bias 1)
    #   row  16  , cols 0:8  -> bq * (1/sqrt(d))
    #   row  17  , cols 0:17 -> [bk | bv | 1]
    #   row  18  , cols 0:64 -> additive attention mask
    wq_t = c_ref[0:8, 0:8]                                                      # (8, 8)
    wkv_t = c_ref[8:16, 0:17]                                                   # (8, 17)
    bq = c_ref[16:17, 0:8]                                                      # (1, 8)
    bkv = c_ref[17:18, 0:17]                                                    # (1, 17)
    mask = c_ref[18:19, 0:64]                                                   # (1, 64)

    # Q projection; bias and 1/sqrt(d) scale are already folded into constants.
    q = jnp.dot(x1_ref[...], wq_t, preferred_element_type=jnp.float32) + bq     # (1, 8)

    # K, V and the ones column in a single MXU pass (seq=64 stays on sublanes).
    kv = jnp.dot(x2_ref[...], wkv_t, preferred_element_type=jnp.float32) + bkv  # (64, 17)

    # Scores: contract the feature dims (NT matmul) -> lane-dense (1, 64); add mask.
    s = lax.dot_general(q, kv[:, 0:8],
                        dimension_numbers=(((1,), (1,)), ((), ())),
                        preferred_element_type=jnp.float32) + mask              # (1, 64)

    # Numerically stable softmax; normalizer l rides along as column 8 of o_aug.
    m = jnp.max(s, axis=-1, keepdims=True)                                      # (1, 1)
    p = jnp.exp(s - m)                                                          # (1, 64)

    o_aug = jnp.dot(p, kv[:, 8:17], preferred_element_type=jnp.float32)         # (1, 9)
    out_ref[...] = o_aug[:, 0:8] * pl.reciprocal(o_aug[:, 8:9], approx=False)   # (1, 8)


def pack_attention_params(wq, bq, wk, bk, wv, bv, attn_mask):
    """One-time packing of the module's constant parameters (bias / 1/sqrt(d)
    folding, weight stacking, mask) into a single (24, 64) f32 operand.
    Call this at init, NOT per forward call."""
    scale = 1.0 / math.sqrt(8.0)
    c = jnp.zeros((24, 64), jnp.float32)
    c = c.at[0:8, 0:8].set((wq.T * scale).astype(jnp.float32))
    c = c.at[8:16, 0:8].set(wk.T.astype(jnp.float32))
    c = c.at[8:16, 8:16].set(wv.T.astype(jnp.float32))
    # Column 16 of the stacked weight stays zero; with bias 1 it produces an
    # all-ones column in kv, so l = sum(p) falls out of the p @ [V|1] matmul.
    c = c.at[16, 0:8].set((bq * scale).astype(jnp.float32))
    c = c.at[17, 0:8].set(bk.astype(jnp.float32))
    c = c.at[17, 8:16].set(bv.astype(jnp.float32))
    c = c.at[17, 16].set(1.0)
    c = c.at[18, 0:64].set(attn_mask.reshape(64).astype(jnp.float32))
    return c


@jax.jit
def attention_forward(x1, x2, consts):
    """x1: (1,1,8)  x2: (1,64,8)  consts: (24,64) prepacked  ->  (1,1,1,8)"""
    x1_2d = x1.reshape(1, 8).astype(jnp.float32)      # free reshape
    x2_2d = x2.reshape(64, 8).astype(jnp.float32)     # free reshape, no transpose

    vmem = pl.BlockSpec(memory_space=pltpu.MemorySpace.VMEM)
    out = pl.pallas_call(
        _attn_kernel,
        out_shape=jax.ShapeDtypeStruct((1, 8), jnp.float32),
        in_specs=[vmem, vmem, vmem],
        out_specs=vmem,
        cost_estimate=pl.CostEstimate(
            flops=20_000, transcendentals=65, bytes_accessed=8_500),
    )(x1_2d, x2_2d, consts)                            # (1, 8), lane-major

    return out.reshape(1, 1, 1, 8)


if __name__ == "__main__":
    key = jax.random.PRNGKey(0)
    keys = jax.random.split(key, 9)

    # Deterministic synthetic parameters (shapes match the PyTorch module).
    attn_mask = jax.random.normal(keys[0], (1, 1, 1, 64), dtype=jnp.float32)
    wq = jax.random.normal(keys[1], (8, 8), dtype=jnp.float32) * 0.1
    bq = jax.random.normal(keys[2], (8,), dtype=jnp.float32) * 0.1
    wk = jax.random.normal(keys[3], (8, 8), dtype=jnp.float32) * 0.1
    bk = jax.random.normal(keys[4], (8,), dtype=jnp.float32) * 0.1
    wv = jax.random.normal(keys[5], (8, 8), dtype=jnp.float32) * 0.1
    bv = jax.random.normal(keys[6], (8,), dtype=jnp.float32) * 0.1

    # Inputs (same shapes as the PyTorch script's x1, x2).
    x1 = jax.random.normal(keys[7], (1, 1, 8), dtype=jnp.float32)
    x2 = jax.random.normal(keys[8], (1, 64, 8), dtype=jnp.float32)

    # One-time parameter packing, hoisted out of the per-call path.
    consts = jax.block_until_ready(
        pack_attention_params(wq, bq, wk, bk, wv, bv, attn_mask))

    out = attention_forward(x1, x2, consts)
    jax.block_until_ready(out)

    # Pure-JAX reference check (same math outside Pallas).
    q = x1 @ wq.T + bq
    k = x2 @ wk.T + bk
    v = x2 @ wv.T + bv
    qk = (q @ jnp.swapaxes(k, -2, -1)) / math.sqrt(8.0) + attn_mask
    ref = jax.nn.softmax(qk, axis=-1) @ v[:, None]
    assert out.shape == (1, 1, 1, 8), out.shape
    assert jnp.allclose(out, ref, atol=2e-5, rtol=2e-5), (out, ref)

    print("KERNEL_OK")
</pallas_src>

<mosaic_0001>
module attributes {stable_mosaic.version = 11 : i64} {
  func.func @_attn_kernel(%arg0: memref<1x8xf32, #tpu.memory_space<vmem>>, %arg1: memref<64x8xf32, #tpu.memory_space<vmem>>, %arg2: memref<24x64xf32, #tpu.memory_space<vmem>>, %arg3: memref<1x8xf32, #tpu.memory_space<vmem>>) attributes {dimension_semantics = [], scalar_prefetch = 0 : i64, scratch_operands = 0 : i64, tpu.core_type = #tpu.core_type<tc>} {
    %c0 = arith.constant 0 : index
    %c0_0 = arith.constant 0 : index
    %0 = vector.load %arg2[%c0, %c0_0] : memref<24x64xf32, #tpu.memory_space<vmem>>, vector<8x8xf32>
    %c8 = arith.constant 8 : index
    %c0_1 = arith.constant 0 : index
    %1 = vector.load %arg2[%c8, %c0_1] : memref<24x64xf32, #tpu.memory_space<vmem>>, vector<8x17xf32>
    %c16 = arith.constant 16 : index
    %c0_2 = arith.constant 0 : index
    %2 = vector.load %arg2[%c16, %c0_2] : memref<24x64xf32, #tpu.memory_space<vmem>>, vector<1x8xf32>
    %c17 = arith.constant 17 : index
    %c0_3 = arith.constant 0 : index
    %3 = vector.load %arg2[%c17, %c0_3] : memref<24x64xf32, #tpu.memory_space<vmem>>, vector<1x17xf32>
    %c18 = arith.constant 18 : index
    %c0_4 = arith.constant 0 : index
    %4 = vector.load %arg2[%c18, %c0_4] : memref<24x64xf32, #tpu.memory_space<vmem>>, vector<1x64xf32>
    %c0_5 = arith.constant 0 : index
    %c0_6 = arith.constant 0 : index
    %5 = vector.load %arg0[%c0_5, %c0_6] : memref<1x8xf32, #tpu.memory_space<vmem>>, vector<1x8xf32>
    %cst = arith.constant dense<0.000000e+00> : vector<1x8xf32>
    %6 = tpu.matmul %5, %0, %cst {dimension_numbers = #tpu.dot_dimension_numbers<[1], [0], [0], [1], [0, 0, 1, 1], [], []>} : vector<1x8xf32>, vector<8x8xf32>, vector<1x8xf32> -> vector<1x8xf32>
    %7 = arith.addf %6, %2 : vector<1x8xf32>
    %c0_7 = arith.constant 0 : index
    %c0_8 = arith.constant 0 : index
    %8 = vector.load %arg1[%c0_7, %c0_8] : memref<64x8xf32, #tpu.memory_space<vmem>>, vector<64x8xf32>
    %cst_9 = arith.constant dense<0.000000e+00> : vector<64x17xf32>
    %9 = tpu.matmul %8, %1, %cst_9 {dimension_numbers = #tpu.dot_dimension_numbers<[1], [0], [0], [1], [0, 0, 1, 1], [], []>} : vector<64x8xf32>, vector<8x17xf32>, vector<64x17xf32> -> vector<64x17xf32>
    %10 = vector.broadcast %3 : vector<1x17xf32> to vector<64x17xf32>
    %11 = arith.addf %9, %10 : vector<64x17xf32>
    %12 = vector.extract_strided_slice %11 {offsets = [0, 0], sizes = [64, 8], strides = [1, 1]} : vector<64x17xf32> to vector<64x8xf32>
    %cst_10 = arith.constant dense<0.000000e+00> : vector<1x64xf32>
    %13 = tpu.matmul %7, %12, %cst_10 {dimension_numbers = #tpu.dot_dimension_numbers<[1], [1], [0], [0], [0, 0, 1, 0], [], []>} : vector<1x8xf32>, vector<64x8xf32>, vector<1x64xf32> -> vector<1x64xf32>
    %14 = arith.addf %13, %4 : vector<1x64xf32>
    %cst_11 = arith.constant dense<0xFF800000> : vector<1xf32>
    %15 = vector.multi_reduction <maximumf>, %14, %cst_11 [1] : vector<1x64xf32> to vector<1xf32>
    %16 = vector.shape_cast %15 : vector<1xf32> to vector<1x1xf32>
    %17 = vector.broadcast %16 : vector<1x1xf32> to vector<1x64xf32>
    %18 = arith.subf %14, %17 : vector<1x64xf32>
    %19 = math.exp %18 : vector<1x64xf32>
    %20 = vector.extract_strided_slice %11 {offsets = [0, 8], sizes = [64, 9], strides = [1, 1]} : vector<64x17xf32> to vector<64x9xf32>
    %cst_12 = arith.constant dense<0.000000e+00> : vector<1x9xf32>
    %21 = tpu.matmul %19, %20, %cst_12 {dimension_numbers = #tpu.dot_dimension_numbers<[1], [0], [0], [1], [0, 0, 1, 1], [], []>} : vector<1x64xf32>, vector<64x9xf32>, vector<1x9xf32> -> vector<1x9xf32>
    %22 = vector.extract_strided_slice %21 {offsets = [0, 0], sizes = [1, 8], strides = [1, 1]} : vector<1x9xf32> to vector<1x8xf32>
    %23 = vector.extract_strided_slice %21 {offsets = [0, 8], sizes = [1, 1], strides = [1, 1]} : vector<1x9xf32> to vector<1x1xf32>
    %24 = tpu.reciprocal %23 : vector<1x1xf32> -> vector<1x1xf32>
    %25 = vector.broadcast %24 : vector<1x1xf32> to vector<1x8xf32>
    %26 = arith.mulf %22, %25 : vector<1x8xf32>
    %c0_13 = arith.constant 0 : index
    %c0_14 = arith.constant 0 : index
    %27 = vector.load %arg3[%c0_13, %c0_14] : memref<1x8xf32, #tpu.memory_space<vmem>>, vector<1x8xf32>
    tpu.vector_store %arg3[%c0_13, %c0_14], %26 {strides = array<i32>} : memref<1x8xf32, #tpu.memory_space<vmem>>, vector<1x8xf32>,
    return
  }
}

</mosaic_0001>

<bundles_post_ra>
// kernel: attention_forward.1
= control target key start
LH: loop header
LB: loop body
LE: loop exit
PB: predicated region body
PF: predicated region fallthrough
CT: control target
= control target key end

     0   :  { %vm21_vm0 = vcmask 64512   ;;  %v651_v2 = vmov 0.0   ;;  %vm652_vm1 = vmmov 0   ;;  %s766_s0 = inlined_call_operand.vmem [shape: f32[1,8], index: 0, kind: input, shape index: {}]   ;;  %s767_s1 = inlined_call_operand.vmem [shape: f32[64,8], index: 1, kind: input, shape index: {}]   ;;  %s768_s2 = inlined_call_operand.vmem [shape: f32[24,64], index: 2, kind: input, shape index: {}]   ;;  %s769_s3 = inlined_call_operand.hbm [shape: f32[1,8], index: 3, kind: output, shape index: {}]  }
   0x1   :  { %v15_v0 = vld [vmem:[%s768_s2] sm:$0xff]  ;;  %510 = vmatprep.subr.mxu1 %v651_v2  ;;  %512 = vmatprep.mubr.msk.f32.mxu1 %vm652_vm1, %v651_v2  ;;  %v16_v3 = vld [vmem:[%s768_s2 + $0x8] sm:$0xff] }
   0x2   :  { %v20_v1 = vld [vmem:[%s766_s0] sm:$0x1]  ;;  %511 = vmatpush3.msra.mxu1 %v15_v0  ;;  %545 = vmatprep.mubr.msk.f32.mxu0 %vm652_vm1, %v651_v2  ;;  %v96_v5 = vld [vmem:[%s767_s1 + $0x8] sm:$0xff] }
   0x3   :  { %v95_v4 = vld [vmem:[%s767_s1] sm:$0xff]  ;;  %513 = vmatmul.mubr.msk.f32.vlgmr.msra.gmra.mrb[0].mxu1 %vm21_vm0, %v20_v1  ;;  %515 = vmatprep.subr.mxu1 %v16_v3 }
   0x4   :  { %516 = vmatpush3.msra.mxu1 %v16_v3  ;;  %517 = vmatprep.mubr.msk.f32.mxu1 %vm21_vm0, %v95_v4 }
   0x5   :  { %8 = vsyncpa [#allocation3], 0  ;;  %v97_v6 = vld [vmem:[%s767_s1 + $0x10] sm:$0xff]  ;;  %v98_v7 = vld [vmem:[%s767_s1 + $0x18] sm:$0xff]  ;;  %v653_v12 = vmov 0.0|0.0   ;;  %vm333_vm3 = vcmask 516096  }
   0x6   :  { %v99_v8 = vld [vmem:[%s767_s1 + $0x20] sm:$0xff]  ;;  %v100_v9 = vld [vmem:[%s767_s1 + $0x28] sm:$0xff]  ;;  %v101_v10 = vld [vmem:[%s767_s1 + $0x30] sm:$0xff]  ;;  %567 = vmatprep.subr.bf16.mxu0 %v653_v12  ;;  %583 = vmatprep.subr.bf16.mxu1 %v653_v12  ;;  %vm364_vm4 = vcmask 523264   ;;  %v655_v4 = vmov 8   ;;  %vm445_vm5 = vcmask 57344  }
   0x7   :  { %518 = vmatmul.mubr.msk.f32.vlgmr.msra.gmra.mrb[2].mxu1 %vm21_vm0, %v96_v5  ;;  %v102_v11 = vld [vmem:[%s767_s1 + $0x38] sm:$0xff]  ;;  %v462_v15 = vld [vmem:[%s768_s2 + $0x11] ss:$0 sm:$0xff]  ;;  %vm729_vm2 = vmpackc.low %vm21_vm0, %vm21_vm0  ;;  %s654_s1 = smov 120   ;;  %621 = vset.pattern.permute.xlu1 %v655_v4 }
   0x8   :  { %520 = vmatprep.mubr.msk.f32.mxu1 %vm21_vm0, %v97_v6  ;;  %v17_v41 = vld [vmem:[%s768_s2 + $0x10] sm:$0x1]  ;;  %v19_v43 = vld [vmem:[%s768_s2 + $0x12] sm:$0x1]  ;;  %622 = vset.pattern.permute.xlu0 %v655_v4  ;;  %s656_s2 = smov [#allocation2]  }
   0x9   :  { %s453_s12 = sshll.u32 %s656_s2, 4  ;;  %s454_s12 = int_to_ptr.vmem [resolvable:$true] %s453_s12 }
   0xa   :  { %s627_s13 = scalar_lea.vmem %s454_s12, 16  ;;  %s631_s14 = scalar_lea.vmem %s454_s12, 32 }
   0xb   :  { %521 = vmatmul.mubr.msk.f32.gmra.mrb[4].mxu1 %vm21_vm0, %v98_v7  ;;  %p628_p0 = scmp.ne.s32.totalorder %s454_s12, %s627_s13  ;;  %p632_p1 = scmp.lt.s32.totalorder %s454_s12, %s454_s12 }
   0xc   :  { %523 = vmatprep.mubr.msk.f32.mxu1 %vm21_vm0, %v99_v8  ;;  %p633_p2 = scmp.lt.s32.totalorder %s631_s14, %s627_s13 }
   0xe   :  { %p634_p3 = por %p633_p2, %p632_p1 }
   0xf   :  { %524 = vmatmul.mubr.msk.f32.gmra.mrb[6].mxu1 %vm21_vm0, %v100_v9 }
  0x10   :  { %526 = vmatprep.mubr.msk.f32.mxu1 %vm21_vm0, %v101_v10  ;;  %p635_p4 = pnand %p634_p3, %p628_p0 }
  0x13   :  { %527 = vmatmul.mubr.msk.f32.gmra.mrb[8].mxu1 %vm21_vm0, %v102_v11 }
  0x14   :  { %564 = vmatprep.mubr.msk.f32.mxu1 %vm652_vm1, %v651_v2 }
  0xd6   :  { %v91_v13 = vpop.f32.mrb[0].mxu1 }
  0xd7   :  { %v514_v14 = vpop.f32.mrb[1].mxu1  ;;  %v92_v42 = vadd.f32 %v91_v13, %v17_v41 }
  0xda   :  { %v519_v16 = vpop.f32.mrb[2].mxu1 }
  0xdb   :  { %v203_v17 = vadd.f32 %v519_v16, %v462_v15  ;;  %v197_v18 = vpop.f32.mrb[3].mxu1 }
  0xdc   :  { %v198_v19 = vadd.f32 %v462_v15, %v197_v18 }
  0xde   :  { %v601_v21 = vpack.i.bf16 %v203_v17, %v198_v19  ;;  %v568_v22 = vpack.c.bf16 %v203_v17, %v198_v19  ;;  %v522_v23 = vpop.f32.mrb[4].mxu1 }
  0xdf   :  { %v213_v24 = vadd.f32 %v522_v23, %v462_v15  ;;  %v207_v25 = vpop.f32.mrb[5].mxu1 }
  0xe0   :  { %570 = vmatpush3.bf16.xpose.msk.msra.mxu0 %vm729_vm2, %v568_v22  ;;  %v208_v26 = vadd.f32 %v462_v15, %v207_v25 }
  0xe1   :  { %571 = vmatprep.subr.bf16.mxu0 %v653_v12 }
  0xe2   :  { %v572_v27 = vpack.c.bf16 %v213_v24, %v208_v26  ;;  %v606_v28 = vpack.i.bf16 %v213_v24, %v208_v26  ;;  %v525_v29 = vpop.f32.mrb[6].mxu1 }
  0xe3   :  { %v223_v30 = vadd.f32 %v525_v29, %v462_v15  ;;  %v217_v31 = vpop.f32.mrb[7].mxu1 }
  0xe4   :  { %607 = vrot.lane.b32.xlu1 %v606_v28, %s654_s1  ;;  %v218_v32 = vadd.f32 %v462_v15, %v217_v31 }
  0xe6   :  { %v611_v33 = vpack.i.bf16 %v223_v30, %v218_v32  ;;  %v576_v34 = vpack.c.bf16 %v223_v30, %v218_v32  ;;  %v528_v35 = vpop.f32.mrb[8].mxu1 }
  0xe7   :  { %v233_v36 = vadd.f32 %v528_v35, %v462_v15  ;;  %v227_v37 = vpop.f32.mrb[9].mxu1 }
  0xe8   :  { %574 = vmatpush3.bf16.xpose.msk.msra.mxu0 %vm729_vm2, %v572_v27  ;;  %612 = vrot.lane.b32.xlu1 %v611_v33, %s654_s1  ;;  %v228_v38 = vadd.f32 %v462_v15, %v227_v37 }
  0xe9   :  { %575 = vmatprep.subr.bf16.mxu0 %v653_v12 }
  0xea   :  { %v616_v39 = vpack.i.bf16 %v233_v36, %v228_v38  ;;  %v580_v40 = vpack.c.bf16 %v233_v36, %v228_v38 }
  0xec   :  { %617 = vrot.lane.b32.xlu1 %v616_v39, %s654_s1 }
  0xf0   :  { %578 = vmatpush3.bf16.xpose.msk.msra.mxu0 %vm729_vm2, %v576_v34 }
  0xf1   :  { %579 = vmatprep.subr.bf16.mxu0 %v653_v12 }
  0xf8   :  { %582 = vmatpush3.bf16.xpose.msk.msra.mxu0 %vm729_vm2, %v580_v40 }
  0xff   :  { %546 = vmatmul.mubr.msk.f32.vlgmr.msra.gmra.mrb[0].mxu0 %vm21_vm0, %v92_v42 }
 0x156   :  { %v608_v49 = vpop.permute.xlu1 %607 }
 0x157   :  { %v610_v54 = vunpack.i.h.bf16 %v608_v49  ;;  %v609_v55 = vunpack.i.l.bf16 %v608_v49 }
 0x159   :  { %v587_v59 = vpack.c.bf16 %v610_v54, %v609_v55 }
 0x15a   :  { %v613_v57 = vpop.permute.xlu1 %612 }
 0x15b   :  { %v615_v60 = vunpack.i.h.bf16 %v613_v57  ;;  %v614_v61 = vunpack.i.l.bf16 %v613_v57 }
 0x15d   :  { %v590_v63 = vpack.c.bf16 %v615_v60, %v614_v61 }
 0x15e   :  { %v618_v62 = vpop.permute.xlu1 %617 }
 0x15f   :  { %v620_v0 = vunpack.i.h.bf16 %v618_v62  ;;  %v619_v1 = vunpack.i.l.bf16 %v618_v62 }
 0x161   :  { %v593_v2 = vpack.c.bf16 %v620_v0, %v619_v1 }
 0x1d2   :  { %v329_v44 = vpop.f32.mrb[0].mxu0 }
 0x1d3   :  { %v330_v45 = vadd.f32 %v329_v44, %v19_v43  ;;  %v547_v46 = vpop.f32.mrb[1].mxu0 }
 0x1d5   :  { %v334_v47 = vsel %vm333_vm3, %v330_v45, -inf }
 0x1d6   :  { %335 = vmax.xlane.f32.xlu0 %v334_v47 }
 0x1ec   :  { %602 = vrot.lane.b32.xlu0 %v601_v21, %s654_s1 }
 0x263   :  { %v336_v48 = vpop.xlane.xlu0 %335 }
 0x264   :  { %v337_v51 = vsub.f32 %v330_v45, %v336_v48 }
 0x266   :  { %v338_v58 = vmul.f32 1.442695, %v337_v51 }
 0x267   :  { %v603_v50 = vpop.permute.xlu0 %602 }
 0x268   :  { %v605_v52 = vunpack.i.h.bf16 %v603_v50  ;;  %v604_v53 = vunpack.i.l.bf16 %v603_v50  ;;  %623 = vpow2.f32 %v338_v58 }
 0x26a   :  { %v584_v56 = vpack.c.bf16 %v605_v52, %v604_v53 }
 0x26c   :  { %585 = vmatpush3.bf16.msra.mxu1 %v584_v56 }
 0x26d   :  { %586 = vmatprep.subr.bf16.mxu1 %v653_v12 }
 0x270   :  { %588 = vmatpush3.bf16.msra.mxu1 %v587_v59 }
 0x271   :  { %589 = vmatprep.subr.bf16.mxu1 %v653_v12 }
 0x272   :  { %v624_v3 = vpop.eup %623 }
 0x274   :  { %591 = vmatpush3.bf16.msra.mxu1 %v590_v63 }
 0x275   :  { %592 = vmatprep.subr.bf16.mxu1 %v653_v12 }
 0x278   :  { %594 = vmatpush3.bf16.msra.mxu1 %v593_v2 }
 0x27b   :  { %565 = vmatmul.mubr.msk.f32.vlgmr.msra.gmra.mrb[10].mxu1 %vm364_vm4, %v624_v3 }
 0x34e   :  { %v434_v5 = vpop.f32.mrb[10].mxu1 }
 0x34f   :  { %625 = vrcp.f32 %v434_v5  ;;  %v566_v6 = vpop.f32.mrb[11].mxu1 }
 0x359   :  { %v626_v7 = vpop.eup %625 }
 0x35a   :  { %441 = vperm.xlu1 %621, %v626_v7  }
 0x3d9   :  { %v442_v8 = vpop.permute.xlu1 %441 }
 0x3da   :  { %v444_v9 = vmul.f32 %v442_v8, %v434_v5 }
 0x3dc   :  { %446 = vst.msk [vmem:[#allocation2] sm:$0x1] %vm445_vm5, %v444_v9 }
 0x3dd   :  { %638 = shalt.err (!%p635_p4)
}
 0x3de   :  { %s639_s17 = scalar_lea.hbm %s769_s3, 16 }
 0x3df   :  { %p640_p5 = scmp.ne.s32.totalorder %s769_s3, %s639_s17  ;;  %p643_p6 = scmp.lt.u32.totalorder %s639_s17, %s769_s3 }
 0x3e1   :  { %p645_p7 = pnand %p643_p6, %p640_p5 }
 0x3e3   :  { %648 = shalt.err (!%p645_p7)
}
 0x3e4   :  { %456 = dma.vmem_to_hbm [thread:$0]  %s454_s12, 16, %s769_s3, [#allocation3]  }
 0x3e5   :  { %649 = dma.done.wait [#allocation3], 16  }
 0x3e6   :  { %650 = vsyncadd [#allocation3], 4294967280 }
 0x3e7   :  { %460 = vsyncpa [#allocation3], 1 }

</bundles_post_ra>
